<compile_context>
chip_gen: v7x
topology: tpu7x:2x2x1
jax: 0.10.0
libtpu: 0.0.40
codegen_flags: <defaults>
</compile_context>

<pallas_src>
from functools import partial

import numpy as np
import jax
import jax.numpy as jnp
from jax import lax
from jax.experimental import pallas as pl
from jax.experimental.pallas import tpu as pltpu


# ----------------------------- schedule math (host / numpy, == __init__) ----
def clip_noise_schedule(alphas2, clip_value=0.001):
    alphas2 = np.concatenate([np.ones(1), alphas2], axis=0)
    alphas_step = alphas2[1:] / alphas2[:-1]
    alphas_step = np.clip(alphas_step, a_min=clip_value, a_max=1.0)
    alphas2 = np.cumprod(alphas_step, axis=0)
    return alphas2


def polynomial_schedule(timesteps: int, s=1e-4, power=3.0):
    steps = timesteps + 1
    x = np.linspace(0, steps, steps)
    alphas2 = (1 - np.power(x / steps, power)) ** 2
    alphas2 = clip_noise_schedule(alphas2, clip_value=0.001)
    precision = 1 - 2 * s
    alphas2 = precision * alphas2 + s
    return alphas2


def cosine_beta_schedule(timesteps, s=0.008, raise_to_power: float = 1):
    steps = timesteps + 2
    x = np.linspace(0, steps, steps)
    alphas_cumprod = np.cos((x / steps + s) / (1 + s) * np.pi * 0.5) ** 2
    alphas_cumprod = alphas_cumprod / alphas_cumprod[0]
    betas = 1 - alphas_cumprod[1:] / alphas_cumprod[:-1]
    betas = np.clip(betas, a_min=0, a_max=0.999)
    alphas = 1.0 - betas
    alphas_cumprod = np.cumprod(alphas, axis=0)
    if raise_to_power != 1:
        alphas_cumprod = np.power(alphas_cumprod, raise_to_power)
    return alphas_cumprod


def linear_schedule(timesteps, clip_min=1e-9):
    t = np.linspace(0, 1, timesteps + 1)
    output = 1 - t
    return np.clip(output, clip_min, 1 - clip_min)


def ccosine_schedule(timesteps, start=0, end=1, tau=1, clip_min=1e-9):
    t = np.linspace(0, 1, timesteps + 1)
    v_start = np.cos(start * np.pi / 2) ** (2 * tau)
    v_end = np.cos(end * np.pi / 2) ** (2 * tau)
    output = np.cos((t * (end - start) + start) * np.pi / 2) ** (2 * tau)
    output = (v_end - output) / (v_end - v_start)
    return np.clip(output, clip_min, 1 - clip_min)


def build_gamma_table(noise_schedule: str, timesteps: int, precision: float) -> np.ndarray:
    if "cosine" in noise_schedule:
        splits = noise_schedule.split("_")
        assert len(splits) <= 2
        power = 1 if len(splits) == 1 else float(splits[1])
        alphas2 = cosine_beta_schedule(timesteps, raise_to_power=power)
    elif "polynomial" in noise_schedule:
        splits = noise_schedule.split("_")
        assert len(splits) == 2
        power = float(splits[1])
        alphas2 = polynomial_schedule(timesteps, s=precision, power=power)
    elif "csin" in noise_schedule:
        splits = noise_schedule.split("_")
        assert len(splits) == 4
        start, end, tau = float(splits[1]), float(splits[2]), float(splits[3])
        alphas2 = ccosine_schedule(timesteps, start=start, end=end, tau=tau)
    elif "linear" in noise_schedule:
        alphas2 = linear_schedule(timesteps)
    else:
        raise ValueError(noise_schedule)
    sigmas2 = 1 - alphas2
    log_alphas2 = np.log(alphas2)
    log_sigmas2 = np.log(sigmas2)
    log_alphas2_to_sigmas2 = log_alphas2 - log_sigmas2
    gamma = (-log_alphas2_to_sigmas2).astype(np.float32)  # shape (timesteps + 1,)
    return gamma


# ----------------------------- Pallas kernel (forward hot path) -------------
def _gamma_lookup_kernel(t_ref, gamma_ref, o_ref, *, timesteps: int):
    # t_ref:     (1, TB)    float32   -- lane-dense batch of timestep fractions
    # gamma_ref: (T1p, 1)   float32   -- sublane-oriented (zero-padded) table
    # o_ref:     (1, TB)    float32   -- lane-dense result
    t = t_ref[...]                                                   # (1, TB)
    # torch.round(t * timesteps).long()  (round-half-to-even), clamped in-range
    idx = jnp.round(t * jnp.float32(timesteps)).astype(jnp.int32)    # (1, TB)
    idx = jnp.clip(idx, 0, timesteps)

    T1p = gamma_ref.shape[0]
    TB = t.shape[1]
    k = lax.broadcasted_iota(jnp.int32, (T1p, TB), 0)                # (T1p, TB)
    # single vselect: pick gamma[k] where k == idx, else 0 (no cast+mul)
    sel = jnp.where(k == idx, gamma_ref[...], jnp.float32(0.0))      # (T1p, TB)
    # sublane reduce lands directly in the lane-dense output row
    o_ref[...] = jnp.sum(sel, axis=0, keepdims=True)                 # (1, TB)


def predefined_noise_schedule_forward(t: jax.Array, gamma_table: jax.Array,
                                      timesteps: int) -> jax.Array:
    """t: any shape, float in [0, 1]; gamma_table: (timesteps + 1,) float32.
    Returns gamma[round(t * timesteps)] with the same shape as t."""
    orig_shape = t.shape
    t_flat = t.reshape(-1).astype(jnp.float32)
    B = t_flat.shape[0]

    # lane-dense padding of the batch axis (multiple of 128 lanes)
    Bp = pl.cdiv(max(B, 1), 128) * 128
    # sublane-aligned padding of the table (multiple of 8); padded rows are
    # never selected because idx is clamped to [0, timesteps].
    T1 = gamma_table.shape[0]
    T1p = pl.cdiv(T1, 8) * 8

    t_row = jnp.zeros((1, Bp), jnp.float32).at[0, :B].set(t_flat)
    gamma_col = jnp.zeros((T1p, 1), jnp.float32).at[:T1, 0].set(
        gamma_table.astype(jnp.float32))

    # Tile the (padded) batch axis; the gamma table stays VMEM-resident
    # across the grid via a constant index_map.
    tile_b = min(Bp, 512)
    num_tiles = Bp // tile_b

    kernel = partial(_gamma_lookup_kernel, timesteps=timesteps)
    out_row = pl.pallas_call(
        kernel,
        out_shape=jax.ShapeDtypeStruct((1, Bp), jnp.float32),
        grid=(num_tiles,),
        in_specs=[
            pl.BlockSpec((1, tile_b), lambda i: (0, i)),   # t: tiled over lanes
            pl.BlockSpec((T1p, 1), lambda i: (0, 0)),      # gamma: resident
        ],
        out_specs=pl.BlockSpec((1, tile_b), lambda i: (0, i)),
        compiler_params=pltpu.CompilerParams(
            dimension_semantics=(
                ("parallel",) if num_tiles > 1 else ("arbitrary",)
            )
        ),
    )(t_row, gamma_col)

    return out_row[0, :B].reshape(orig_shape)


# ----------------------------- driver ---------------------------------------
if __name__ == "__main__":
    noise_schedule = "polynomial_2"
    timesteps = 100
    precision = 1e-5
    B = 8

    gamma_np = build_gamma_table(noise_schedule, timesteps, precision)
    gamma_table = jnp.asarray(gamma_np, dtype=jnp.float32)

    key = jax.random.PRNGKey(0)
    t = jax.random.uniform(key, (B, 1), dtype=jnp.float32)  # t in [0, 1)

    out = predefined_noise_schedule_forward(t, gamma_table, timesteps)
    out = jax.block_until_ready(out)

    # pure-JAX reference of the forward pass
    t_int = jnp.round(t * timesteps).astype(jnp.int32)
    ref = gamma_table[t_int[:, 0]].reshape(B, 1)

    np.testing.assert_allclose(np.asarray(out), np.asarray(ref), rtol=1e-6, atol=1e-6)
    print("KERNEL_OK")
</pallas_src>

<mosaic_0001>
module attributes {stable_mosaic.version = 11 : i64} {
  func.func @_gamma_lookup_kernel(%arg0: i32, %arg1: memref<1x128xf32, #tpu.memory_space<vmem>>, %arg2: memref<104x1xf32, #tpu.memory_space<vmem>>, %arg3: memref<1x128xf32, #tpu.memory_space<vmem>>) attributes {dimension_semantics = [#tpu.dimension_semantics<arbitrary>], iteration_bounds = array<i64: 1>, scalar_prefetch = 0 : i64, scratch_operands = 0 : i64, tpu.core_type = #tpu.core_type<tc>, window_params = [{transform_indices = @transform_0, window_bounds = array<i64: 1, 128>}, {pipeline_mode = #tpu.pipeline_mode<synchronous>, transform_indices = @transform_1, window_bounds = array<i64: 104, 1>}, {transform_indices = @transform_2, window_bounds = array<i64: 1, 128>}]} {
    %c0 = arith.constant 0 : index
    %c0_0 = arith.constant 0 : index
    %0 = vector.load %arg1[%c0, %c0_0] : memref<1x128xf32, #tpu.memory_space<vmem>>, vector<1x128xf32>
    %cst = arith.constant 1.000000e+02 : f32
    %1 = vector.broadcast %cst : f32 to vector<1x128xf32>
    %2 = arith.mulf %0, %1 : vector<1x128xf32>
    %3 = math.roundeven %2 : vector<1x128xf32>
    %4 = arith.fptosi %3 : vector<1x128xf32> to vector<1x128xi32>
    %c0_i32 = arith.constant 0 : i32
    %c100_i32 = arith.constant 100 : i32
    %5 = vector.broadcast %c0_i32 : i32 to vector<1x128xi32>
    %6 = arith.maxsi %5, %4 : vector<1x128xi32>
    %7 = vector.broadcast %c100_i32 : i32 to vector<1x128xi32>
    %8 = arith.minsi %7, %6 : vector<1x128xi32>
    %9 = tpu.iota {dimensions = array<i32: 0>} : vector<104x128xi32>
    %10 = vector.broadcast %8 : vector<1x128xi32> to vector<104x128xi32>
    %11 = arith.cmpi eq, %9, %10 : vector<104x128xi32>
    %c0_1 = arith.constant 0 : index
    %c0_2 = arith.constant 0 : index
    %12 = vector.load %arg2[%c0_1, %c0_2] : memref<104x1xf32, #tpu.memory_space<vmem>>, vector<104x1xf32>
    %cst_3 = arith.constant 0.000000e+00 : f32
    %13 = vector.shape_cast %12 : vector<104x1xf32> to vector<104x1xf32>
    %14 = vector.broadcast %13 : vector<104x1xf32> to vector<104x128xf32>
    %15 = vector.broadcast %cst_3 : f32 to vector<104x128xf32>
    %16 = arith.select %11, %14, %15 : vector<104x128xi1>, vector<104x128xf32>
    %cst_4 = arith.constant dense<0.000000e+00> : vector<128xf32>
    %17 = vector.multi_reduction <add>, %16, %cst_4 [0] : vector<104x128xf32> to vector<128xf32>
    %18 = vector.shape_cast %17 : vector<128xf32> to vector<1x128xf32>
    %c0_5 = arith.constant 0 : index
    %c0_6 = arith.constant 0 : index
    %19 = vector.load %arg3[%c0_5, %c0_6] : memref<1x128xf32, #tpu.memory_space<vmem>>, vector<1x128xf32>
    tpu.vector_store %arg3[%c0_5, %c0_6], %18 {strides = array<i32>} : memref<1x128xf32, #tpu.memory_space<vmem>>, vector<1x128xf32>,
    return
  }
  func.func @transform_0(%arg0: i32) -> (i32, i32) {
    %c0_i32 = arith.constant 0 : i32
    %c0_i32_0 = arith.constant 0 : i32
    return %c0_i32, %arg0 : i32, i32
  }
  func.func @transform_1(%arg0: i32) -> (i32, i32) {
    %c0_i32 = arith.constant 0 : i32
    %c0_i32_0 = arith.constant 0 : i32
    %c0_i32_1 = arith.constant 0 : i32
    return %c0_i32, %c0_i32_0 : i32, i32
  }
  func.func @transform_2(%arg0: i32) -> (i32, i32) {
    %c0_i32 = arith.constant 0 : i32
    %c0_i32_0 = arith.constant 0 : i32
    return %c0_i32, %arg0 : i32, i32
  }
}

</mosaic_0001>

<bundles_post_ra>
// kernel: tpu_custom_call.1
= control target key start
LH: loop header
LB: loop body
LE: loop exit
PB: predicated region body
PF: predicated region fallthrough
CT: control target
= control target key end

     0   :  { %v205_v2 = vmov 0   ;;  %s291_s0 = inlined_call_operand.vmem [shape: f32[1,128], index: 0, kind: input, shape index: {}]   ;;  %s292_s1 = inlined_call_operand.vmem [shape: f32[104,1], index: 1, kind: input, shape index: {}]   ;;  %s293_s2 = inlined_call_operand.hbm [shape: f32[1,128], index: 2, kind: output, shape index: {}]  }
   0x1   :  { %v52_v0 = vld [vmem:[%s292_s1 + $0x10] sm:$0xff]  ;;  %v50_v1 = vld [vmem:[%s292_s1] sm:$0xff]  ;;  %180 = vset.pattern.permute.xlu1 %v205_v2  ;;  %179 = vset.pattern.permute.xlu0 %v205_v2  ;;  %v53_v3 = vld [vmem:[%s292_s1 + $0x18] sm:$0xff] }
   0x2   :  { %75 = vperm.xlu1 %180, %v52_v0   ;;  %65 = vperm.xlu0 %179, %v50_v1   ;;  %v51_v4 = vld [vmem:[%s292_s1 + $0x8] sm:$0xff] }
   0x3   :  { %7 = vsyncpa [#allocation3], 0  ;;  %v55_v5 = vld [vmem:[%s292_s1 + $0x28] sm:$0xff]  ;;  %v54_v6 = vld [vmem:[%s292_s1 + $0x20] sm:$0xff]  ;;  %v19_v17 = vlaneseq }
   0x4   :  { %v57_v7 = vld [vmem:[%s292_s1 + $0x38] sm:$0xff]  ;;  %v56_v8 = vld [vmem:[%s292_s1 + $0x30] sm:$0xff]  ;;  %v59_v9 = vld [vmem:[%s292_s1 + $0x48] sm:$0xff] }
   0x5   :  { %v58_v10 = vld [vmem:[%s292_s1 + $0x40] sm:$0xff]  ;;  %v61_v11 = vld [vmem:[%s292_s1 + $0x58] sm:$0xff]  ;;  %v60_v12 = vld [vmem:[%s292_s1 + $0x50] sm:$0xff]  ;;  %v20_v19 = vshrl.u32 %v19_v17, 7 }
   0x6   :  { %80 = vperm.xlu1 %180, %v53_v3   ;;  %70 = vperm.xlu0 %179, %v51_v4   ;;  %v62_v13 = vld [vmem:[%s292_s1 + $0x60] sm:$0xff] }
   0x7   :  { %v12_v14 = vld [vmem:[%s291_s0] sm:$0x1]  ;;  %v35_v20 = vsub.s32 0, %v20_v19  ;;  %v21_v23 = vadd.s32 8, %v20_v19  ;;  %v22_v25 = vadd.s32 16, %v20_v19  ;;  %v23_v27 = vadd.s32 24, %v20_v19 }
   0x8   :  { %v13_v15 = vmul.f32 100.0, %v12_v14  ;;  %v24_v30 = vadd.s32 32, %v20_v19  ;;  %v25_v34 = vadd.s32 40, %v20_v19  ;;  %v26_v39 = vadd.s32 48, %v20_v19  ;;  %s206_s0 = smov [#allocation2]  }
   0x9   :  { %v27_v42 = vadd.s32 56, %v20_v19  ;;  %v28_v47 = vadd.s32 64, %v20_v19  ;;  %v29_v50 = vadd.s32 72, %v20_v19  ;;  %v30_v55 = vadd.s32 80, %v20_v19  ;;  %s166_s1 = sshll.u32 %s206_s0, 4  ;;  %s167_s1 = int_to_ptr.vmem [resolvable:$true] %s166_s1 }
   0xa   :  { %90 = vperm.xlu1 %180, %v55_v5   ;;  %85 = vperm.xlu0 %179, %v54_v6   ;;  %v176_v16 = vcvt.f32.s32 %v13_v15  ;;  %v31_v58 = vadd.s32 88, %v20_v19  ;;  %v32_v62 = vadd.s32 96, %v20_v19  ;;  %s181_s9 = scalar_lea.vmem %s167_s1, 16  ;;  %s185_s10 = scalar_lea.vmem %s167_s1, 32 }
   0xb   :  { %p182_p0 = scmp.ne.s32.totalorder %s167_s1, %s181_s9  ;;  %p186_p1 = scmp.lt.s32.totalorder %s167_s1, %s167_s1 }
   0xc   :  { %vm15_vm0 = vcmp.gt.s32.totalorder %v176_v16, 0  ;;  %p187_p2 = scmp.lt.s32.totalorder %s185_s10, %s181_s9 }
   0xd   :  { %v16_v18 = vsel %vm15_vm0, %v176_v16, 0 }
   0xe   :  { %100 = vperm.xlu1 %180, %v57_v7   ;;  %95 = vperm.xlu0 %179, %v56_v8   ;;  %vm17_vm1 = vcmp.lt.s32.totalorder %v16_v18, 100  ;;  %p188_p3 = por %p187_p2, %p186_p1 }
   0xf   :  { %v18_v21 = vsel %vm17_vm1, %v16_v18, 100 }
  0x10   :  { %v264_v22 = vrot.slane %v18_v21, %v35_v20  ;;  %p189_p4 = pnand %p188_p3, %p182_p0 }
  0x12   :  { %110 = vperm.xlu1 %180, %v59_v9   ;;  %105 = vperm.xlu0 %179, %v58_v10   ;;  %vm37_vm2 = vcmp.eq.s32.totalorder %v20_v19, %v264_v22  ;;  %vm38_vm3 = vcmp.eq.s32.totalorder %v21_v23, %v264_v22  ;;  %vm39_vm4 = vcmp.eq.s32.totalorder %v22_v25, %v264_v22 }
  0x13   :  { %vm40_vm5 = vcmp.eq.s32.totalorder %v23_v27, %v264_v22  ;;  %vm41_vm6 = vcmp.eq.s32.totalorder %v24_v30, %v264_v22  ;;  %vm42_vm7 = vcmp.eq.s32.totalorder %v25_v34, %v264_v22  ;;  %vm43_vm8 = vcmp.eq.s32.totalorder %v26_v39, %v264_v22 }
  0x14   :  { %vm44_vm9 = vcmp.eq.s32.totalorder %v27_v42, %v264_v22  ;;  %vm45_vm10 = vcmp.eq.s32.totalorder %v28_v47, %v264_v22  ;;  %vm46_vm11 = vcmp.eq.s32.totalorder %v29_v50, %v264_v22  ;;  %vm47_vm12 = vcmp.eq.s32.totalorder %v30_v55, %v264_v22 }
  0x15   :  { %vm48_vm13 = vcmp.eq.s32.totalorder %v31_v58, %v264_v22  ;;  %vm49_vm14 = vcmp.eq.s32.totalorder %v32_v62, %v264_v22 }
  0x16   :  { %120 = vperm.xlu1 %180, %v61_v11   ;;  %115 = vperm.xlu0 %179, %v60_v12  }
  0x1a   :  { %125 = vperm.xlu0 %179, %v62_v13  }
  0x81   :  { %v76_v24 = vpop.permute.xlu1 %75  ;;  %v66_v26 = vpop.permute.xlu0 %65 }
  0x82   :  { %v128_v31 = vsel %vm37_vm2, %v66_v26, 0.0  ;;  %v130_v35 = vsel %vm39_vm4, %v76_v24, 0.0 }
  0x85   :  { %v81_v28 = vpop.permute.xlu1 %80  ;;  %v71_v29 = vpop.permute.xlu0 %70 }
  0x86   :  { %v129_v32 = vsel %vm38_vm3, %v71_v29, 0.0  ;;  %v131_v40 = vsel %vm40_vm5, %v81_v28, 0.0 }
  0x87   :  { %v141_v33 = vadd.f32 %v129_v32, %v128_v31 }
  0x89   :  { %v142_v36 = vadd.f32 %v141_v33, %v130_v35  ;;  %v91_v37 = vpop.permute.xlu1 %90  ;;  %v86_v38 = vpop.permute.xlu0 %85 }
  0x8a   :  { %v132_v43 = vsel %vm41_vm6, %v86_v38, 0.0  ;;  %v133_v48 = vsel %vm42_vm7, %v91_v37, 0.0 }
  0x8b   :  { %v143_v41 = vadd.f32 %v142_v36, %v131_v40 }
  0x8d   :  { %v144_v44 = vadd.f32 %v143_v41, %v132_v43  ;;  %v101_v45 = vpop.permute.xlu1 %100  ;;  %v96_v46 = vpop.permute.xlu0 %95 }
  0x8e   :  { %v134_v51 = vsel %vm43_vm8, %v96_v46, 0.0  ;;  %v135_v56 = vsel %vm44_vm9, %v101_v45, 0.0 }
  0x8f   :  { %v145_v49 = vadd.f32 %v144_v44, %v133_v48 }
  0x91   :  { %v146_v52 = vadd.f32 %v145_v49, %v134_v51  ;;  %v111_v53 = vpop.permute.xlu1 %110  ;;  %v106_v54 = vpop.permute.xlu0 %105 }
  0x92   :  { %v136_v59 = vsel %vm45_vm10, %v106_v54, 0.0  ;;  %v137_v63 = vsel %vm46_vm11, %v111_v53, 0.0 }
  0x93   :  { %v147_v57 = vadd.f32 %v146_v52, %v135_v56 }
  0x95   :  { %v148_v60 = vadd.f32 %v147_v57, %v136_v59  ;;  %v116_v61 = vpop.permute.xlu0 %115  ;;  %v121_v0 = vpop.permute.xlu1 %120 }
  0x96   :  { %v138_v2 = vsel %vm47_vm12, %v116_v61, 0.0  ;;  %v139_v5 = vsel %vm48_vm13, %v121_v0, 0.0 }
  0x97   :  { %v149_v1 = vadd.f32 %v148_v60, %v137_v63 }
  0x99   :  { %v150_v3 = vadd.f32 %v149_v1, %v138_v2  ;;  %v126_v4 = vpop.permute.xlu0 %125 }
  0x9a   :  { %v140_v7 = vsel %vm49_vm14, %v126_v4, 0.0 }
  0x9b   :  { %v151_v6 = vadd.f32 %v150_v3, %v139_v5 }
  0x9d   :  { %v152_v8 = vadd.f32 %v151_v6, %v140_v7 }
  0x9f   :  { %v153_v9 = vrot.slane %v152_v8, 4 }
  0xa1   :  { %v154_v10 = vadd.f32 %v153_v9, %v152_v8 }
  0xa3   :  { %v155_v11 = vrot.slane %v154_v10, 2 }
  0xa5   :  { %v156_v12 = vadd.f32 %v155_v11, %v154_v10 }
  0xa7   :  { %v157_v13 = vrot.slane %v156_v12, 1 }
  0xa9   :  { %v158_v14 = vadd.f32 %v157_v13, %v156_v12 }
  0xab   :  { %159 = vst [vmem:[#allocation2] sm:$0x1] %v158_v14 }
  0xac   :  { %192 = shalt.err (!%p189_p4)
}
  0xad   :  { %s193_s13 = scalar_lea.hbm %s293_s2, 16 }
  0xae   :  { %p194_p5 = scmp.ne.s32.totalorder %s293_s2, %s193_s13  ;;  %p197_p6 = scmp.lt.u32.totalorder %s193_s13, %s293_s2 }
  0xb0   :  { %p199_p7 = pnand %p197_p6, %p194_p5 }
  0xb2   :  { %202 = shalt.err (!%p199_p7)
}
  0xb3   :  { %169 = dma.vmem_to_hbm [thread:$0]  %s167_s1, 16, %s293_s2, [#allocation3]  }
  0xb4   :  { %203 = dma.done.wait [#allocation3], 16  }
  0xb5   :  { %204 = vsyncadd [#allocation3], 4294967280 }
  0xb6   :  { %173 = vsyncpa [#allocation3], 1 }

</bundles_post_ra>
